<compile_context>
chip_gen: v6e
topology: v6e:2x2x1
jax: 0.10.0
libtpu: 0.0.40
codegen_flags: <defaults>
</compile_context>

<pallas_src>
import jax
import jax.numpy as jnp
from jax.experimental import pallas as pl
from jax.experimental.pallas import tpu as pltpu

LANE = 128
SUBLANE = 8
H1 = 128
H2 = 64


def _round_up(x, m):
    return (x + m - 1) // m * m


def dqn_kernel(x_ref, w1_ref, b1_ref, w2_ref, b2_ref, w3_ref, b3_ref, o_ref):
    # fc1 + ReLU: bf16 MXU matmul, f32 accumulate, f32 bias/activation.
    h1 = jnp.dot(x_ref[...], w1_ref[...], preferred_element_type=jnp.float32)
    h1 = jnp.maximum(h1 + b1_ref[...], 0.0)
    # fc2 + ReLU.
    h2 = jnp.dot(h1.astype(jnp.bfloat16), w2_ref[...],
                 preferred_element_type=jnp.float32)
    h2 = jnp.maximum(h2 + b2_ref[...], 0.0)
    # fc3 (no activation); output is lane-dense (padded to 128 columns).
    out = jnp.dot(h2.astype(jnp.bfloat16), w3_ref[...],
                  preferred_element_type=jnp.float32)
    o_ref[...] = (out + b3_ref[...]).astype(o_ref.dtype)


def dqn_forward(x, params, *, block_b=1024):
    """x: (B, input_dim) float32. params: dict with transposed weights (in, out) + (1, out) biases."""
    B, in_dim = x.shape
    out_dim = params["w3"].shape[1]

    k_pad = _round_up(max(in_dim, 1), LANE)
    n_pad = _round_up(max(out_dim, 1), LANE)

    # Batch tile: multiple of 8 (sublane rule), capped for VMEM headroom on v7x.
    tb = min(_round_up(block_b, SUBLANE), _round_up(B, SUBLANE))
    b_pad = _round_up(B, tb)

    # Streamed input: zero-pad to (B_pad, k_pad) and cast to bf16 (halves HBM bytes).
    xp = jnp.zeros((b_pad, k_pad), jnp.bfloat16).at[:B, :in_dim].set(
        x.astype(jnp.bfloat16))

    # Resident weights: zero-pad w1 rows (K) and w3/b3 columns (N); bf16 matmul
    # operands, f32 biases.
    w1 = jnp.zeros((k_pad, H1), jnp.bfloat16).at[:in_dim, :].set(
        params["w1"].astype(jnp.bfloat16))
    w2 = params["w2"].astype(jnp.bfloat16)
    w3 = jnp.zeros((H2, n_pad), jnp.bfloat16).at[:, :out_dim].set(
        params["w3"].astype(jnp.bfloat16))
    b1 = params["b1"].astype(jnp.float32)
    b2 = params["b2"].astype(jnp.float32)
    b3 = jnp.zeros((1, n_pad), jnp.float32).at[:, :out_dim].set(
        params["b3"].astype(jnp.float32))

    grid = (b_pad // tb,)
    full = lambda a: pl.BlockSpec(a.shape, lambda i: (0,) * a.ndim)

    flops = 2 * B * (in_dim * H1 + H1 * H2 + H2 * out_dim)
    bytes_accessed = (
        xp.size * 2 + b_pad * n_pad * 4                        # streamed x + out
        + (w1.size + w2.size + w3.size) * 2                    # bf16 weights
        + (b1.size + b2.size + b3.size) * 4)                   # f32 biases

    out = pl.pallas_call(
        dqn_kernel,
        out_shape=jax.ShapeDtypeStruct((b_pad, n_pad), jnp.float32),
        grid=grid,
        in_specs=[
            pl.BlockSpec((tb, k_pad), lambda i: (i, 0)),       # x: tiled over batch
            full(w1), full(b1), full(w2), full(b2), full(w3), full(b3),
        ],
        out_specs=pl.BlockSpec((tb, n_pad), lambda i: (i, 0)),
        compiler_params=pltpu.CompilerParams(
            dimension_semantics=("parallel",),
            vmem_limit_bytes=48 * 1024 * 1024,
        ),
        cost_estimate=pl.CostEstimate(
            flops=flops, transcendentals=0, bytes_accessed=bytes_accessed),
    )(xp, w1, b1, w2, b2, w3, b3)

    # Slice away batch padding and the zero-padded (fake) action columns.
    return out[:B, :out_dim]


def init_params(key, input_dim, output_dim):
    """Deterministic init matching nn.Linear shapes (stored transposed, f32)."""
    ks = jax.random.split(key, 6)

    def lin(kw, kb, fan_in, fan_out):
        bound = 1.0 / jnp.sqrt(fan_in)
        w = jax.random.uniform(kw, (fan_in, fan_out), jnp.float32, -bound, bound)
        b = jax.random.uniform(kb, (1, fan_out), jnp.float32, -bound, bound)
        return w, b

    w1, b1 = lin(ks[0], ks[1], input_dim, H1)
    w2, b2 = lin(ks[2], ks[3], H1, H2)
    w3, b3 = lin(ks[4], ks[5], H2, output_dim)
    return {"w1": w1, "b1": b1, "w2": w2, "b2": b2, "w3": w3, "b3": b3}


def dqn_reference(x, p, bf16_matmul=True):
    c = (lambda a: a.astype(jnp.bfloat16)) if bf16_matmul else (lambda a: a)
    h1 = jnp.maximum(
        jnp.dot(c(x), c(p["w1"]), preferred_element_type=jnp.float32) + p["b1"], 0.0)
    h2 = jnp.maximum(
        jnp.dot(c(h1), c(p["w2"]), preferred_element_type=jnp.float32) + p["b2"], 0.0)
    return jnp.dot(c(h2), c(p["w3"]), preferred_element_type=jnp.float32) + p["b3"]


if __name__ == "__main__":
    key = jax.random.PRNGKey(0)
    k_param, k_x = jax.random.split(key)

    batch, input_dim, output_dim = 8, 16, 4
    params = init_params(k_param, input_dim, output_dim)
    x = jax.random.normal(k_x, (batch, input_dim), jnp.float32)

    out = jax.block_until_ready(dqn_forward(x, params))

    ref_bf16 = dqn_reference(x, params, bf16_matmul=True)   # mirrors kernel numerics
    ref_f32 = dqn_reference(x, params, bf16_matmul=False)   # PyTorch f32 semantics

    assert out.shape == (batch, output_dim)
    assert jnp.allclose(out, ref_bf16, atol=2e-3, rtol=2e-3)
    assert jnp.allclose(out, ref_f32, atol=5e-2, rtol=5e-2)

    print("KERNEL_OK")
</pallas_src>

<mosaic_0001>
module attributes {stable_mosaic.version = 11 : i64} {
  func.func @dqn_kernel(%arg0: i32, %arg1: memref<8x128xbf16, #tpu.memory_space<vmem>>, %arg2: memref<128x128xbf16, #tpu.memory_space<vmem>>, %arg3: memref<1x128xf32, #tpu.memory_space<vmem>>, %arg4: memref<128x64xbf16, #tpu.memory_space<vmem>>, %arg5: memref<1x64xf32, #tpu.memory_space<vmem>>, %arg6: memref<64x128xbf16, #tpu.memory_space<vmem>>, %arg7: memref<1x128xf32, #tpu.memory_space<vmem>>, %arg8: memref<8x128xf32, #tpu.memory_space<vmem>>) attributes {dimension_semantics = [#tpu.dimension_semantics<parallel>], iteration_bounds = array<i64: 1>, scalar_prefetch = 0 : i64, scratch_operands = 0 : i64, tpu.core_type = #tpu.core_type<tc>, window_params = [{transform_indices = @transform_0, window_bounds = array<i64: 8, 128>}, {pipeline_mode = #tpu.pipeline_mode<synchronous>, transform_indices = @transform_1, window_bounds = array<i64: 128, 128>}, {pipeline_mode = #tpu.pipeline_mode<synchronous>, transform_indices = @transform_2, window_bounds = array<i64: 1, 128>}, {pipeline_mode = #tpu.pipeline_mode<synchronous>, transform_indices = @transform_3, window_bounds = array<i64: 128, 64>}, {pipeline_mode = #tpu.pipeline_mode<synchronous>, transform_indices = @transform_4, window_bounds = array<i64: 1, 64>}, {pipeline_mode = #tpu.pipeline_mode<synchronous>, transform_indices = @transform_5, window_bounds = array<i64: 64, 128>}, {pipeline_mode = #tpu.pipeline_mode<synchronous>, transform_indices = @transform_6, window_bounds = array<i64: 1, 128>}, {transform_indices = @transform_7, window_bounds = array<i64: 8, 128>}]} {
    %c0 = arith.constant 0 : index
    %c0_0 = arith.constant 0 : index
    %0 = vector.load %arg1[%c0, %c0_0] : memref<8x128xbf16, #tpu.memory_space<vmem>>, vector<8x128xbf16>
    %c0_1 = arith.constant 0 : index
    %c0_2 = arith.constant 0 : index
    %1 = vector.load %arg2[%c0_1, %c0_2] : memref<128x128xbf16, #tpu.memory_space<vmem>>, vector<128x128xbf16>
    %cst = arith.constant dense<0.000000e+00> : vector<8x128xf32>
    %2 = tpu.matmul %0, %1, %cst {dimension_numbers = #tpu.dot_dimension_numbers<[1], [0], [0], [1], [0, 0, 1, 1], [], []>} : vector<8x128xbf16>, vector<128x128xbf16>, vector<8x128xf32> -> vector<8x128xf32>
    %c0_3 = arith.constant 0 : index
    %c0_4 = arith.constant 0 : index
    %3 = vector.load %arg3[%c0_3, %c0_4] : memref<1x128xf32, #tpu.memory_space<vmem>>, vector<1x128xf32>
    %4 = vector.broadcast %3 : vector<1x128xf32> to vector<8x128xf32>
    %5 = arith.addf %2, %4 : vector<8x128xf32>
    %cst_5 = arith.constant 0.000000e+00 : f32
    %6 = vector.broadcast %cst_5 : f32 to vector<8x128xf32>
    %7 = arith.maximumf %5, %6 : vector<8x128xf32>
    %8 = arith.truncf %7 : vector<8x128xf32> to vector<8x128xbf16>
    %c0_6 = arith.constant 0 : index
    %c0_7 = arith.constant 0 : index
    %9 = vector.load %arg4[%c0_6, %c0_7] : memref<128x64xbf16, #tpu.memory_space<vmem>>, vector<128x64xbf16>
    %cst_8 = arith.constant dense<0.000000e+00> : vector<8x64xf32>
    %10 = tpu.matmul %8, %9, %cst_8 {dimension_numbers = #tpu.dot_dimension_numbers<[1], [0], [0], [1], [0, 0, 1, 1], [], []>} : vector<8x128xbf16>, vector<128x64xbf16>, vector<8x64xf32> -> vector<8x64xf32>
    %c0_9 = arith.constant 0 : index
    %c0_10 = arith.constant 0 : index
    %11 = vector.load %arg5[%c0_9, %c0_10] : memref<1x64xf32, #tpu.memory_space<vmem>>, vector<1x64xf32>
    %12 = vector.broadcast %11 : vector<1x64xf32> to vector<8x64xf32>
    %13 = arith.addf %10, %12 : vector<8x64xf32>
    %cst_11 = arith.constant 0.000000e+00 : f32
    %14 = vector.broadcast %cst_11 : f32 to vector<8x64xf32>
    %15 = arith.maximumf %13, %14 : vector<8x64xf32>
    %16 = arith.truncf %15 : vector<8x64xf32> to vector<8x64xbf16>
    %c0_12 = arith.constant 0 : index
    %c0_13 = arith.constant 0 : index
    %17 = vector.load %arg6[%c0_12, %c0_13] : memref<64x128xbf16, #tpu.memory_space<vmem>>, vector<64x128xbf16>
    %cst_14 = arith.constant dense<0.000000e+00> : vector<8x128xf32>
    %18 = tpu.matmul %16, %17, %cst_14 {dimension_numbers = #tpu.dot_dimension_numbers<[1], [0], [0], [1], [0, 0, 1, 1], [], []>} : vector<8x64xbf16>, vector<64x128xbf16>, vector<8x128xf32> -> vector<8x128xf32>
    %c0_15 = arith.constant 0 : index
    %c0_16 = arith.constant 0 : index
    %19 = vector.load %arg7[%c0_15, %c0_16] : memref<1x128xf32, #tpu.memory_space<vmem>>, vector<1x128xf32>
    %20 = vector.broadcast %19 : vector<1x128xf32> to vector<8x128xf32>
    %21 = arith.addf %18, %20 : vector<8x128xf32>
    %c0_17 = arith.constant 0 : index
    %c0_18 = arith.constant 0 : index
    %22 = vector.load %arg8[%c0_17, %c0_18] : memref<8x128xf32, #tpu.memory_space<vmem>>, vector<8x128xf32>
    tpu.vector_store %arg8[%c0_17, %c0_18], %21 {strides = array<i32>} : memref<8x128xf32, #tpu.memory_space<vmem>>, vector<8x128xf32>,
    return
  }
  func.func @transform_0(%arg0: i32) -> (i32, i32) {
    %c0_i32 = arith.constant 0 : i32
    %c0_i32_0 = arith.constant 0 : i32
    return %arg0, %c0_i32 : i32, i32
  }
  func.func @transform_1(%arg0: i32) -> (i32, i32) {
    %c0_i32 = arith.constant 0 : i32
    %c0_i32_0 = arith.constant 0 : i32
    %c0_i32_1 = arith.constant 0 : i32
    return %c0_i32, %c0_i32_0 : i32, i32
  }
  func.func @transform_2(%arg0: i32) -> (i32, i32) {
    %c0_i32 = arith.constant 0 : i32
    %c0_i32_0 = arith.constant 0 : i32
    %c0_i32_1 = arith.constant 0 : i32
    return %c0_i32, %c0_i32_0 : i32, i32
  }
  func.func @transform_3(%arg0: i32) -> (i32, i32) {
    %c0_i32 = arith.constant 0 : i32
    %c0_i32_0 = arith.constant 0 : i32
    %c0_i32_1 = arith.constant 0 : i32
    return %c0_i32, %c0_i32_0 : i32, i32
  }
  func.func @transform_4(%arg0: i32) -> (i32, i32) {
    %c0_i32 = arith.constant 0 : i32
    %c0_i32_0 = arith.constant 0 : i32
    %c0_i32_1 = arith.constant 0 : i32
    return %c0_i32, %c0_i32_0 : i32, i32
  }
  func.func @transform_5(%arg0: i32) -> (i32, i32) {
    %c0_i32 = arith.constant 0 : i32
    %c0_i32_0 = arith.constant 0 : i32
    %c0_i32_1 = arith.constant 0 : i32
    return %c0_i32, %c0_i32_0 : i32, i32
  }
  func.func @transform_6(%arg0: i32) -> (i32, i32) {
    %c0_i32 = arith.constant 0 : i32
    %c0_i32_0 = arith.constant 0 : i32
    %c0_i32_1 = arith.constant 0 : i32
    return %c0_i32, %c0_i32_0 : i32, i32
  }
  func.func @transform_7(%arg0: i32) -> (i32, i32) {
    %c0_i32 = arith.constant 0 : i32
    %c0_i32_0 = arith.constant 0 : i32
    return %arg0, %c0_i32 : i32, i32
  }
}

</mosaic_0001>

<bundles_post_ra>
// kernel: tpu_custom_call.1
= control target key start
LH: loop header
LB: loop body
LE: loop exit
PB: predicated region body
PF: predicated region fallthrough
CT: control target
= control target key end

     0   :  { %12 = vsyncpa [#allocation3], 0  ;;  %s678_s0 = inlined_call_operand.hbm [shape: bf16[8,128], index: 0, kind: input, shape index: {}]   ;;  %s679_s1 = inlined_call_operand.vmem [shape: bf16[128,128], index: 1, kind: input, shape index: {}]   ;;  %s680_s2 = inlined_call_operand.vmem [shape: f32[1,128], index: 2, kind: input, shape index: {}]   ;;  %s681_s3 = inlined_call_operand.vmem [shape: bf16[128,64], index: 3, kind: input, shape index: {}]   ;;  %s682_s4 = inlined_call_operand.vmem [shape: f32[1,64], index: 4, kind: input, shape index: {}]   ;;  %s683_s5 = inlined_call_operand.vmem [shape: bf16[64,128], index: 5, kind: input, shape index: {}]   ;;  %s684_s6 = inlined_call_operand.vmem [shape: f32[1,128], index: 6, kind: input, shape index: {}]   ;;  %s685_s7 = inlined_call_operand.hbm [shape: f32[8,128], index: 7, kind: output, shape index: {}]  }
   0x1   :  { %13 = vsyncpa [#allocation4], 0  ;;  %s533_s24 = smov [#allocation2]  }
   0x2   :  { %s20_s25 = sshll.u32 %s533_s24, 4  ;;  %s21_s25 = int_to_ptr.vmem [resolvable:$true] %s20_s25 }
   0x3   :  { %s497_s26 = scalar_lea.vmem %s21_s25, 64  ;;  %p502_p1 = scmp.lt.s32.totalorder %s21_s25, %s21_s25 }
   0x4   :  { %p498_p0 = scmp.ne.s32.totalorder %s21_s25, %s497_s26  ;;  %p503_p2 = scmp.lt.s32.totalorder %s497_s26, %s497_s26 }
   0x6   :  { %p504_p3 = por %p503_p2, %p502_p1 }
   0x8   :  { %p505_p4 = pnand %p504_p3, %p498_p0 }
   0xa   :  { %508 = shalt.err (!%p505_p4)
}
   0xb   :  { %23 = dma.hbm_to_vmem [thread:$0]  %s678_s0, 64, %s21_s25, [#allocation3]  }
   0xc   :  { %529 = dma.done.wait [#allocation3], 64  }
   0xd   :  { %530 = vsyncadd [#allocation3], 4294967232  ;;  %v534_v0 = vmov 0.0   ;;  %vm535_vm0 = vmmov 0   ;;  %v469_v1 = vld [vmem:[%s679_s1 + $0x38] sm:$0xff]   ;;  %v470_v2 = vld [vmem:[%s679_s1 + $0x30] sm:$0xff]  }
   0xe   :  { %413 = vmatprep.subr.bf16.mxu0 %v534_v0  ;;  %429 = vmatprep.mubr.msk.bf16.mxu0 %vm535_vm0, %v534_v0  ;;  %v471_v3 = vld [vmem:[%s679_s1 + $0x28] sm:$0xff]   ;;  %v477_v4 = vld [vmem:[%s681_s3 + $0x38] sm:$0xff]   ;;  %v472_v5 = vld [vmem:[%s679_s1 + $0x20] sm:$0xff]   ;;  %vm306_vm1 = vcmask 523264   ;;  %s536_s24 = smov [#allocation5]  }
   0xf   :  { %433 = vmatprep.subr.bf16.mxu1 %v534_v0  ;;  %449 = vmatprep.mubr.msk.bf16.mxu1 %vm535_vm0, %v534_v0  ;;  %v478_v6 = vld [vmem:[%s681_s3 + $0x30] sm:$0xff]   ;;  %v473_v7 = vld [vmem:[%s679_s1 + $0x18] sm:$0xff]   ;;  %v479_v8 = vld [vmem:[%s681_s3 + $0x28] sm:$0xff]  }
  0x10   :  { %414 = vmatpush3.bf16.msra.mxu0 %v469_v1  ;;  %434 = vmatpush3.bf16.msra.mxu1 %v477_v4  ;;  %v474_v9 = vld [vmem:[%s679_s1 + $0x10] sm:$0xff]   ;;  %v480_v10 = vld [vmem:[%s681_s3 + $0x20] sm:$0xff]   ;;  %v475_v11 = vld [vmem:[%s679_s1 + $0x8] sm:$0xff]  }
  0x11   :  { %415 = vmatprep.subr.bf16.mxu0 %v534_v0  ;;  %435 = vmatprep.subr.bf16.mxu1 %v534_v0  ;;  %v481_v12 = vld [vmem:[%s681_s3 + $0x18] sm:$0xff]   ;;  %v476_v13 = vld [vmem:[%s679_s1] sm:$0xff]   ;;  %v482_v14 = vld [vmem:[%s681_s3 + $0x10] sm:$0xff]  }
  0x12   :  { %v40_v15 = vld [vmem:[#allocation2] sm:$0xf]  ;;  %v483_v16 = vld [vmem:[%s681_s3 + $0x8] sm:$0xff]   ;;  %v485_v18 = vld [vmem:[%s683_s5 + $0x18] sm:$0xff]  }
  0x13   :  { %v484_v17 = vld [vmem:[%s681_s3] sm:$0xff]   ;;  %v486_v19 = vld [vmem:[%s683_s5 + $0x10] sm:$0xff]   ;;  %v487_v28 = vld [vmem:[%s683_s5 + $0x8] sm:$0xff]  }
  0x14   :  { %416 = vmatpush3.bf16.msra.mxu0 %v470_v2  ;;  %436 = vmatpush3.bf16.msra.mxu1 %v478_v6  ;;  %v366_v20 = vld [vmem:[%s680_s2] ss:$0 sm:$0xff] }
  0x15   :  { %417 = vmatprep.subr.bf16.mxu0 %v534_v0  ;;  %437 = vmatprep.subr.bf16.mxu1 %v534_v0  ;;  %v488_v29 = vld [vmem:[%s683_s5] sm:$0xff]   ;;  %s357_s5 = sshll.u32 %s536_s24, 4  ;;  %s358_s5 = int_to_ptr.vmem [resolvable:$true] %s357_s5 }
  0x16   :  { %v375_v30 = vld [vmem:[%s682_s4] ss:$0 sm:$0xff]  ;;  %s509_s4 = scalar_lea.vmem %s358_s5, 128  ;;  %p514_p6 = scmp.lt.s32.totalorder %s358_s5, %s358_s5 }
  0x17   :  { %v384_v38 = vld [vmem:[%s684_s6] ss:$0 sm:$0xff]  ;;  %p510_p5 = scmp.ne.s32.totalorder %s358_s5, %s509_s4  ;;  %p515_p7 = scmp.lt.s32.totalorder %s509_s4, %s509_s4 }
  0x18   :  { %418 = vmatpush3.bf16.msra.mxu0 %v471_v3  ;;  %438 = vmatpush3.bf16.msra.mxu1 %v479_v8 }
  0x19   :  { %419 = vmatprep.subr.bf16.mxu0 %v534_v0  ;;  %439 = vmatprep.subr.bf16.mxu1 %v534_v0  ;;  %p516_p8 = por %p515_p7, %p514_p6 }
  0x1b   :  { %p517_p9 = pnand %p516_p8, %p510_p5 }
  0x1c   :  { %420 = vmatpush3.bf16.msra.mxu0 %v472_v5  ;;  %440 = vmatpush3.bf16.msra.mxu1 %v480_v10 }
  0x1d   :  { %421 = vmatprep.subr.bf16.mxu0 %v534_v0  ;;  %441 = vmatprep.subr.bf16.mxu1 %v534_v0 }
  0x20   :  { %422 = vmatpush3.bf16.msra.mxu0 %v473_v7  ;;  %442 = vmatpush3.bf16.msra.mxu1 %v481_v12 }
  0x21   :  { %423 = vmatprep.subr.bf16.mxu0 %v534_v0  ;;  %443 = vmatprep.subr.bf16.mxu1 %v534_v0 }
  0x24   :  { %424 = vmatpush3.bf16.msra.mxu0 %v474_v9  ;;  %444 = vmatpush3.bf16.msra.mxu1 %v482_v14 }
  0x25   :  { %425 = vmatprep.subr.bf16.mxu0 %v534_v0  ;;  %445 = vmatprep.subr.bf16.mxu1 %v534_v0 }
  0x28   :  { %426 = vmatpush3.bf16.msra.mxu0 %v475_v11  ;;  %446 = vmatpush3.bf16.msra.mxu1 %v483_v16 }
  0x29   :  { %427 = vmatprep.subr.bf16.mxu0 %v534_v0  ;;  %447 = vmatprep.subr.bf16.mxu1 %v534_v0 }
  0x2c   :  { %428 = vmatpush3.bf16.msra.mxu0 %v476_v13  ;;  %448 = vmatpush3.bf16.msra.mxu1 %v484_v17 }
  0x2d   :  { %453 = vmatprep.subr.bf16.mxu0 %v534_v0 }
  0x2f   :  { %430 = vmatmul.mubr.bf16.vlgmr.msra.gmra.mxu0 %v40_v15 }
  0x30   :  { %461 = vmatprep.mubr.msk.bf16.mxu0 %vm535_vm0, %v534_v0  ;;  %454 = vmatpush3.bf16.msra.mxu0 %v485_v18 }
  0x31   :  { %455 = vmatprep.subr.bf16.mxu0 %v534_v0 }
  0x34   :  { %456 = vmatpush3.bf16.msra.mxu0 %v486_v19 }
  0x35   :  { %457 = vmatprep.subr.bf16.mxu0 %v534_v0 }
  0x38   :  { %458 = vmatpush3.bf16.msra.mxu0 %v487_v28 }
  0x39   :  { %459 = vmatprep.subr.bf16.mxu0 %v534_v0 }
  0x3c   :  { %460 = vmatpush3.bf16.msra.mxu0 %v488_v29 }
  0xef   :  { %v146_v21 = vpop.f32.mrf.mxu0 }
  0xf0   :  { %v147_v22 = vadd.f32 %v366_v20, %v146_v21 }
  0xf1   :  { %v431_v23 = vpop.f32.mrf.mxu0 }
  0xf2   :  { %v152_v24 = vmax.f32 %v147_v22, 0.0 }
  0xf3   :  { %v149_v25 = vpop.f32.mrf.mxu0 }
  0xf4   :  { %v153_v26 = vpack.c.bf16 %v152_v24, %v152_v24 }
  0xf5   :  { %v432_v27 = vpop.f32.mrf.mxu0 }
  0xf6   :  { %450 = vmatmul.mubr.bf16.vlgmr.msra.gmra.mxu1 %v153_v26 }
 0x1b6   :  { %v259_v31 = vpop.f32.mrf.mxu1 }
 0x1b7   :  { %v260_v32 = vadd.f32 %v375_v30, %v259_v31 }
 0x1b8   :  { %v451_v33 = vpop.f32.mrf.mxu1 }
 0x1b9   :  { %v265_v34 = vmax.f32 %v260_v32, 0.0 }
 0x1ba   :  { %v262_v35 = vpop.f32.mrf.mxu1 }
 0x1bb   :  { %v266_v36 = vpack.c.bf16 %v265_v34, %v265_v34 }
 0x1bc   :  { %v452_v37 = vpop.f32.mrf.mxu1 }
 0x1bd   :  { %462 = vmatmul.mubr.msk.bf16.vlgmr.msra.gmra.mxu0 %vm306_vm1, %v266_v36 }
 0x27d   :  { %v344_v39 = vpop.f32.mrf.mxu0 }
 0x27e   :  { %v345_v40 = vadd.f32 %v384_v38, %v344_v39 }
 0x27f   :  { %v463_v41 = vpop.f32.mrf.mxu0 }
 0x280   :  { %350 = vst [vmem:[#allocation5] sm:$0xff] %v345_v40 }
 0x281   :  { %v347_v42 = vpop.f32.mrf.mxu0 }
 0x282   :  { %520 = shalt.err (!%p517_p9)
}
 0x283   :  { %360 = dma.vmem_to_hbm [thread:$0]  %s358_s5, 128, %s685_s7, [#allocation4]   ;;  %v464_v43 = vpop.f32.mrf.mxu0 }
 0x284   :  { %531 = dma.done.wait [#allocation4], 128  }
 0x285   :  { %532 = vsyncadd [#allocation4], 4294967168 }
 0x286   :  { %364 = vsyncpa [#allocation3], 1 }
 0x287   :  { %365 = vsyncpa [#allocation4], 1 }

</bundles_post_ra>
